<compile_context>
chip_gen: v5e
topology: v5e:2x2
jax: 0.10.0
libtpu: 0.0.40
codegen_flags: <defaults>
</compile_context>

<pallas_src>
import functools

import jax
import jax.numpy as jnp
from jax.experimental import pallas as pl
from jax.experimental.pallas import tpu as pltpu


# ----------------------------------------------------------------------------
# Kernel: per-pixel cross-entropy (reduction='none') + per-tile OHEM threshold
#         partial sums.
#   loss_p = logsumexp_c(x[:, p]) - x[t_p, p]
# ----------------------------------------------------------------------------
def _ce_kernel(logits_ref, target_ref, loss_ref, part_ref, *, hw, threshold):
    x = logits_ref[...].astype(jnp.float32)          # (C, TP)  classes on sublanes
    t = target_ref[...]                              # (1, TP)  int32
    C, TP = x.shape

    m = jnp.max(x, axis=0, keepdims=True)            # (1, TP)
    lse = jnp.log(jnp.sum(jnp.exp(x - m), axis=0, keepdims=True)) + m

    class_ids = jax.lax.broadcasted_iota(jnp.int32, (C, TP), 0)
    x_t = jnp.sum(jnp.where(class_ids == t, x, 0.0), axis=0, keepdims=True)

    loss = lse - x_t                                  # (1, TP)

    # Ragged-tail / padded lanes: mark invalid so the glue can reshape the
    # whole padded loss tensor straight into top_k (no slice copy) without
    # leaking garbage/NaN values from OOB input lanes.
    j = pl.program_id(1)
    lane = jax.lax.broadcasted_iota(jnp.int32, (1, TP), 1)
    valid = (j * TP + lane) < hw
    loss_ref[...] = jnp.where(valid, loss, jnp.float32(-1e30))   # lane-dense store

    # Per-tile partial threshold stats.
    sel = jnp.logical_and(valid, loss > threshold)
    sum_thr = jnp.sum(jnp.where(sel, loss, 0.0))
    cnt_thr = jnp.sum(jnp.where(sel, 1.0, 0.0))

    lane128 = jax.lax.broadcasted_iota(jnp.int32, (1, 128), 1)
    part_ref[...] = jnp.where(lane128 == 0, sum_thr,
                              jnp.where(lane128 == 1, cnt_thr, 0.0))


# ----------------------------------------------------------------------------
# Tiling / VMEM budgeting (generation-aware)
# ----------------------------------------------------------------------------
def _vmem_phys_bytes():
    try:
        v = int(pltpu.get_tpu_info().vmem_capacity_bytes)
        if v >= (32 << 20):
            return v
    except Exception:
        pass
    return 64 << 20            # conservative fallback (v7x per-TC VMEM)


def _pick_tiling(N, C, HW, tp):
    vmem_phys = _vmem_phys_bytes()
    # Double-buffered working-set budget; leave ample headroom for compiler
    # scratch (v7x: ~28 MiB budget of 64 MiB; v5e/v6e: 48 MiB of 128 MiB).
    budget = max(8 << 20, min(vmem_phys // 2 - (4 << 20), 48 << 20))

    # Per-lane VMEM bytes of the double-buffered blocks:
    #   logits block (C, tp) f32 padded to 8 sublanes, target (1, tp) i32 and
    #   loss (1, tp) f32 both padded to 8 sublanes.
    c_sub = ((max(C, 1) + 7) // 8) * 8
    per_lane = 2 * (c_sub + 8 + 8) * 4

    hw_ceil = pl.cdiv(HW, 128) * 128
    if tp is None:
        cap = max(128, (budget // per_lane) // 128 * 128)
        tp = min(cap, hw_ceil)
        # Keep >= ~4 total grid steps (when HW allows) so both v7x TensorCores
        # get tiles; both grid axes are "parallel".
        min_steps = 4
        if N * pl.cdiv(HW, tp) < min_steps:
            want_tiles = pl.cdiv(min_steps, N)
            tp = min(tp, max(128, pl.cdiv(pl.cdiv(HW, want_tiles), 128) * 128))
    tp = max(128, min(int(tp), hw_ceil))

    footprint = per_lane * tp + (1 << 20)             # + partials & misc
    vmem_limit = max(footprint + (8 << 20), 32 << 20)
    vmem_limit = min(vmem_limit, vmem_phys - (8 << 20))
    vmem_limit = max(vmem_limit, footprint)           # never below the footprint
    return tp, int(vmem_limit)


# ----------------------------------------------------------------------------
# Wrapper
# ----------------------------------------------------------------------------
def ohem_cross_entropy_loss(output_nchw, target_nhw, *, threshold, keep_num,
                            tp=None):
    """Equivalent of OHEM_CrossEntroy_Loss(threshold, keep_num)(output, target)."""
    N, C, H, W = output_nchw.shape
    HW = H * W
    M = N * HW

    tp, vmem_limit = _pick_tiling(N, C, HW, tp)
    n_tiles = pl.cdiv(HW, tp)
    hw_pad = n_tiles * tp

    # Native layout, free reshapes only (no transpose, no pad copies).
    logits = output_nchw.reshape(N, C, HW)            # classes on sublanes
    target = target_nhw.reshape(N, 1, HW).astype(jnp.int32)

    loss_p, parts = pl.pallas_call(
        functools.partial(_ce_kernel, hw=HW, threshold=float(threshold)),
        out_shape=(
            jax.ShapeDtypeStruct((N, 1, hw_pad), jnp.float32),
            jax.ShapeDtypeStruct((N, n_tiles, 1, 128), jnp.float32),
        ),
        grid_spec=pltpu.PrefetchScalarGridSpec(
            num_scalar_prefetch=0,
            grid=(N, n_tiles),
            in_specs=[
                pl.BlockSpec((None, C, tp), lambda n, j: (n, 0, j)),
                pl.BlockSpec((None, 1, tp), lambda n, j: (n, 0, j)),
            ],
            out_specs=(
                pl.BlockSpec((None, 1, tp), lambda n, j: (n, 0, j)),
                pl.BlockSpec((None, None, 1, 128), lambda n, j: (n, j, 0, 0)),
            ),
        ),
        compiler_params=pltpu.CompilerParams(
            dimension_semantics=("parallel", "parallel"),
            vmem_limit_bytes=vmem_limit),
    )(logits, target)

    # ---- glue: reduce tiny per-tile partials, branch, (maybe) top-k ----
    # Padded lanes were masked to -1e30 in-kernel, so this reshape is free
    # (no slicing copy) and safe to feed into top_k.
    loss_flat = loss_p.reshape(N * hw_pad)

    parts2 = parts.reshape(N * n_tiles, 128)
    sum_thr = jnp.sum(parts2[:, 0])
    cnt_thr = jnp.sum(parts2[:, 1])

    # Clamp keep_num like before (the PyTorch reference would index OOB for
    # keep_num >= M; documented deviation).
    kn = int(min(int(keep_num), M - 1))

    # sorted_desc[kn] > threshold  <=>  count(loss > threshold) >= kn + 1
    pred = cnt_thr >= jnp.float32(kn + 1)

    def _thr_branch(_):
        # Only taken when cnt_thr >= kn + 1 >= 1, so the divide is safe.
        return sum_thr / cnt_thr

    def _topk_branch(_):
        # TODO(synk): no Pallas TPU sort/top_k primitive; done in XLA glue and
        # only executed when the threshold branch is not taken.
        topk_vals, _ = jax.lax.top_k(loss_flat, kn + 1)   # descending
        # keep_num == 0 -> mean of empty slice -> NaN (matches torch.mean([])).
        return jnp.sum(topk_vals[:kn]) / jnp.float32(kn)

    return jax.lax.cond(pred, _thr_branch, _topk_branch, 0)


# ----------------------------------------------------------------------------
# Pure-JAX reference (for correctness check only)
# ----------------------------------------------------------------------------
def _reference(output_nchw, target_nhw, threshold, keep_num):
    N, C, H, W = output_nchw.shape
    logits = jnp.transpose(output_nchw, (0, 2, 3, 1)).reshape(-1, C).astype(jnp.float32)
    target = target_nhw.reshape(-1).astype(jnp.int32)
    logz = jax.scipy.special.logsumexp(logits, axis=-1)
    loss = logz - jnp.take_along_axis(logits, target[:, None], axis=-1)[:, 0]
    sorted_desc = -jnp.sort(-loss)
    thr_k = sorted_desc[keep_num]
    mask = sorted_desc > threshold
    mean_thr = jnp.sum(jnp.where(mask, sorted_desc, 0.0)) / jnp.sum(mask)
    mean_topk = jnp.mean(sorted_desc[:keep_num])
    return jnp.where(thr_k > threshold, mean_thr, mean_topk)


if __name__ == "__main__":
    key = jax.random.PRNGKey(0)
    k1, k2 = jax.random.split(key)

    # module "params": threshold / keep_num (deterministic, from __init__)
    keep_num = 100

    # small shapes: batch=2, classes=4, spatial=16x16 -> M = 512 pixels
    N, C, H, W = 2, 4, 16, 16
    output = jax.random.normal(k1, (N, C, H, W), dtype=jnp.float32)
    target = jax.random.randint(k2, (N, H, W), 0, C, dtype=jnp.int32)

    # threshold=0.7 exercises the threshold branch (no top_k executed);
    # threshold=5.0 exercises the mean-of-top-k branch.
    for threshold in (0.7, 5.0):
        result = ohem_cross_entropy_loss(output, target,
                                         threshold=threshold, keep_num=keep_num)
        result = jax.block_until_ready(result)
        ref = _reference(output, target, threshold, keep_num)
        assert jnp.allclose(result, ref, rtol=1e-5, atol=1e-5), (threshold, result, ref)

    print("KERNEL_OK")
</pallas_src>

<mosaic_0001>
module attributes {stable_mosaic.version = 11 : i64} {
  func.func @_ce_kernel(%arg0: i32, %arg1: i32, %arg2: memref<1x4x128xf32, #tpu.memory_space<vmem>>, %arg3: memref<1x1x128xi32, #tpu.memory_space<vmem>>, %arg4: memref<1x1x128xf32, #tpu.memory_space<vmem>>, %arg5: memref<1x1x1x128xf32, #tpu.memory_space<vmem>>) attributes {dimension_semantics = [#tpu.dimension_semantics<parallel>, #tpu.dimension_semantics<parallel>], iteration_bounds = array<i64: 2, 2>, scalar_prefetch = 0 : i64, scratch_operands = 0 : i64, tpu.core_type = #tpu.core_type<tc>, window_params = [{transform_indices = @transform_0, window_bounds = array<i64: 1, 4, 128>}, {transform_indices = @transform_1, window_bounds = array<i64: 1, 1, 128>}, {transform_indices = @transform_2, window_bounds = array<i64: 1, 1, 128>}, {transform_indices = @transform_3, window_bounds = array<i64: 1, 1, 1, 128>}]} {
    %c0 = arith.constant 0 : index
    %c0_0 = arith.constant 0 : index
    %c0_1 = arith.constant 0 : index
    %0 = vector.load %arg2[%c0, %c0_0, %c0_1] : memref<1x4x128xf32, #tpu.memory_space<vmem>>, vector<1x4x128xf32>
    %1 = vector.shape_cast %0 : vector<1x4x128xf32> to vector<4x128xf32>
    %c0_2 = arith.constant 0 : index
    %c0_3 = arith.constant 0 : index
    %c0_4 = arith.constant 0 : index
    %2 = vector.load %arg3[%c0_2, %c0_3, %c0_4] : memref<1x1x128xi32, #tpu.memory_space<vmem>>, vector<1x1x128xi32>
    %3 = vector.shape_cast %2 : vector<1x1x128xi32> to vector<1x128xi32>
    %cst = arith.constant dense<0xFF800000> : vector<128xf32>
    %4 = vector.multi_reduction <maximumf>, %1, %cst [0] : vector<4x128xf32> to vector<128xf32>
    %5 = vector.shape_cast %4 : vector<128xf32> to vector<1x128xf32>
    %6 = vector.broadcast %5 : vector<1x128xf32> to vector<4x128xf32>
    %7 = arith.subf %1, %6 : vector<4x128xf32>
    %8 = math.exp %7 : vector<4x128xf32>
    %cst_5 = arith.constant dense<0.000000e+00> : vector<128xf32>
    %9 = vector.multi_reduction <add>, %8, %cst_5 [0] : vector<4x128xf32> to vector<128xf32>
    %10 = vector.shape_cast %9 : vector<128xf32> to vector<1x128xf32>
    %11 = math.log %10 : vector<1x128xf32>
    %12 = arith.addf %11, %5 : vector<1x128xf32>
    %13 = tpu.iota {dimensions = array<i32: 0>} : vector<4x128xi32>
    %14 = vector.broadcast %3 : vector<1x128xi32> to vector<4x128xi32>
    %15 = arith.cmpi eq, %13, %14 : vector<4x128xi32>
    %cst_6 = arith.constant 0.000000e+00 : f32
    %16 = vector.broadcast %cst_6 : f32 to vector<4x128xf32>
    %17 = arith.select %15, %1, %16 : vector<4x128xi1>, vector<4x128xf32>
    %cst_7 = arith.constant dense<0.000000e+00> : vector<128xf32>
    %18 = vector.multi_reduction <add>, %17, %cst_7 [0] : vector<4x128xf32> to vector<128xf32>
    %19 = vector.shape_cast %18 : vector<128xf32> to vector<1x128xf32>
    %20 = arith.subf %12, %19 : vector<1x128xf32>
    %21 = tpu.iota {dimensions = array<i32: 1>} : vector<1x128xi32>
    %c128_i32 = arith.constant 128 : i32
    %22 = arith.muli %arg1, %c128_i32 : i32
    %23 = vector.broadcast %22 : i32 to vector<1x128xi32>
    %24 = arith.addi %23, %21 : vector<1x128xi32>
    %c256_i32 = arith.constant 256 : i32
    %25 = vector.broadcast %c256_i32 : i32 to vector<1x128xi32>
    %26 = arith.cmpi slt, %24, %25 : vector<1x128xi32>
    %cst_8 = arith.constant -1.000000e+30 : f32
    %27 = vector.broadcast %cst_8 : f32 to vector<1x128xf32>
    %28 = arith.select %26, %20, %27 : vector<1x128xi1>, vector<1x128xf32>
    %c0_9 = arith.constant 0 : index
    %c0_10 = arith.constant 0 : index
    %c0_11 = arith.constant 0 : index
    %29 = vector.load %arg4[%c0_9, %c0_10, %c0_11] : memref<1x1x128xf32, #tpu.memory_space<vmem>>, vector<1x1x128xf32>
    %30 = vector.shape_cast %29 : vector<1x1x128xf32> to vector<1x128xf32>
    %31 = vector.shape_cast %28 : vector<1x128xf32> to vector<1x1x128xf32>
    tpu.vector_store %arg4[%c0_9, %c0_10, %c0_11], %31 {strides = array<i32>} : memref<1x1x128xf32, #tpu.memory_space<vmem>>, vector<1x1x128xf32>,
    %cst_12 = arith.constant 0.699999988 : f32
    %32 = vector.broadcast %cst_12 : f32 to vector<1x128xf32>
    %33 = arith.cmpf ogt, %20, %32 : vector<1x128xf32>
    %34 = arith.andi %26, %33 : vector<1x128xi1>
    %cst_13 = arith.constant 0.000000e+00 : f32
    %35 = vector.broadcast %cst_13 : f32 to vector<1x128xf32>
    %36 = arith.select %34, %20, %35 : vector<1x128xi1>, vector<1x128xf32>
    %37 = vector.shape_cast %36 : vector<1x128xf32> to vector<1x1x128xf32>
    %cst_14 = arith.constant dense<0.000000e+00> : vector<1xf32>
    %38 = vector.multi_reduction <add>, %37, %cst_14 [1, 2] : vector<1x1x128xf32> to vector<1xf32>
    %39 = vector.shape_cast %38 : vector<1xf32> to vector<1x1x1xf32>
    %40 = vector.extract %39[0, 0, 0] : f32 from vector<1x1x1xf32>
    %cst_15 = arith.constant 1.000000e+00 : f32
    %cst_16 = arith.constant 0.000000e+00 : f32
    %41 = vector.broadcast %cst_15 : f32 to vector<1x128xf32>
    %42 = vector.broadcast %cst_16 : f32 to vector<1x128xf32>
    %43 = arith.select %34, %41, %42 : vector<1x128xi1>, vector<1x128xf32>
    %44 = vector.shape_cast %43 : vector<1x128xf32> to vector<1x1x128xf32>
    %cst_17 = arith.constant dense<0.000000e+00> : vector<1xf32>
    %45 = vector.multi_reduction <add>, %44, %cst_17 [1, 2] : vector<1x1x128xf32> to vector<1xf32>
    %46 = vector.shape_cast %45 : vector<1xf32> to vector<1x1x1xf32>
    %47 = vector.extract %46[0, 0, 0] : f32 from vector<1x1x1xf32>
    %48 = tpu.iota {dimensions = array<i32: 1>} : vector<1x128xi32>
    %c0_i32 = arith.constant 0 : i32
    %49 = vector.broadcast %c0_i32 : i32 to vector<1x128xi32>
    %50 = arith.cmpi eq, %48, %49 : vector<1x128xi32>
    %c1_i32 = arith.constant 1 : i32
    %51 = vector.broadcast %c1_i32 : i32 to vector<1x128xi32>
    %52 = arith.cmpi eq, %48, %51 : vector<1x128xi32>
    %cst_18 = arith.constant 0.000000e+00 : f32
    %53 = vector.broadcast %47 : f32 to vector<1x128xf32>
    %54 = vector.broadcast %cst_18 : f32 to vector<1x128xf32>
    %55 = arith.select %52, %53, %54 : vector<1x128xi1>, vector<1x128xf32>
    %56 = vector.broadcast %40 : f32 to vector<1x128xf32>
    %57 = arith.select %50, %56, %55 : vector<1x128xi1>, vector<1x128xf32>
    %c0_19 = arith.constant 0 : index
    %c0_20 = arith.constant 0 : index
    %c0_21 = arith.constant 0 : index
    %c0_22 = arith.constant 0 : index
    %58 = vector.load %arg5[%c0_19, %c0_20, %c0_21, %c0_22] : memref<1x1x1x128xf32, #tpu.memory_space<vmem>>, vector<1x1x1x128xf32>
    %59 = vector.shape_cast %58 : vector<1x1x1x128xf32> to vector<1x128xf32>
    %60 = vector.shape_cast %57 : vector<1x128xf32> to vector<1x1x1x128xf32>
    tpu.vector_store %arg5[%c0_19, %c0_20, %c0_21, %c0_22], %60 {strides = array<i32>} : memref<1x1x1x128xf32, #tpu.memory_space<vmem>>, vector<1x1x1x128xf32>,
    return
  }
  func.func @transform_0(%arg0: i32, %arg1: i32) -> (i32, i32, i32) {
    %c0_i32 = arith.constant 0 : i32
    %c0_i32_0 = arith.constant 0 : i32
    return %arg0, %c0_i32, %arg1 : i32, i32, i32
  }
  func.func @transform_1(%arg0: i32, %arg1: i32) -> (i32, i32, i32) {
    %c0_i32 = arith.constant 0 : i32
    %c0_i32_0 = arith.constant 0 : i32
    return %arg0, %c0_i32, %arg1 : i32, i32, i32
  }
  func.func @transform_2(%arg0: i32, %arg1: i32) -> (i32, i32, i32) {
    %c0_i32 = arith.constant 0 : i32
    %c0_i32_0 = arith.constant 0 : i32
    return %arg0, %c0_i32, %arg1 : i32, i32, i32
  }
  func.func @transform_3(%arg0: i32, %arg1: i32) -> (i32, i32, i32, i32) {
    %c0_i32 = arith.constant 0 : i32
    %c0_i32_0 = arith.constant 0 : i32
    %c0_i32_1 = arith.constant 0 : i32
    return %arg0, %arg1, %c0_i32, %c0_i32_0 : i32, i32, i32, i32
  }
}

</mosaic_0001>

<bundles_post_ra>
// kernel: tpu_custom_call.1
= control target key start
LH: loop header
LB: loop body
LE: loop exit
PB: predicated region body
PF: predicated region fallthrough
CT: control target
= control target key end

     0   :  { %9 = vsyncpa [#allocation3], 0  ;;  %s1016_s0 = inlined_call_operand.hbm [shape: f32[2,4,256], index: 0, kind: input, shape index: {}]   ;;  %s1017_s1 = inlined_call_operand.hbm [shape: s32[2,1,256], index: 1, kind: input, shape index: {}]   ;;  %s1018_s2 = inlined_call_operand.hbm [shape: f32[2,1,256], index: 2, kind: output, shape index: {0}]   ;;  %s1019_s3 = inlined_call_operand.hbm [shape: f32[2,2,1,128], index: 3, kind: output, shape index: {1}]  }
   0x1   :  { %11 = vsyncpa [#allocation3 + $0x1], 0 }
   0x2   :  { %12 = vsyncpa [#allocation6], 0 }
   0x3   :  { %14 = vsyncpa [#allocation6 + $0x1], 0 }
   0x4   :  { %15 = vsyncpa [#allocation4], 0 }
   0x5   :  { %17 = vsyncpa [#allocation4 + $0x1], 0 }
   0x6   :  { %18 = vsyncpa [#allocation9], 0 }
   0x7   :  { %20 = vsyncpa [#allocation9 + $0x1], 0  ;;  %s828_s12 = smov 0   ;;  %s830_s13 = smov 0  }
   0x8   :  { %s832_s14 = smov 0   ;;  %s834_s15 = smov 0  }
   0x9   :  { %s836_s16 = smov 0   ;;  %s838_s17 = smov 0  }
   0xa   :  { %s840_s18 = smov 0   ;;  %s842_s19 = smov 0  }
   0xb LB: > { %s498_s20 = sadd.s32 4294967295, %s805_s19   ;;  %s499_s21 = sadd.s32 4294967294, %s805_s19   ;;  %s805_s19 = sphi %s842_s19, %s26_s19   ;;  %s801_s18 = sphi %s840_s18, %s1034_s18   ;;  %s797_s17 = sphi %s838_s17, %s1033_s17   ;;  %s793_s16 = sphi %s836_s16, %s1032_s16   ;;  %s789_s15 = sphi %s834_s15, %s1031_s15   ;;  %s785_s14 = sphi %s832_s14, %s1030_s14   ;;  %s781_s13 = sphi %s830_s13, %s1029_s13   ;;  %s777_s12 = sphi %s828_s12, %s1028_s12  }
   0xc   : > { %s35_s22 = sadd.s32 1, %s797_s17  ;;  %s38_s23 = sadd.s32 1, %s801_s18 }
   0xd   : > { %p36_p0 = scmp.ge.s32.totalorder %s35_s22, 2  ;;  %s47_s24 = sadd.s32 1, %s785_s14 }
   0xe   : > { %p54_p1 = scmp.ne.s32.totalorder %s785_s14, %s781_s13  ;;  %p55_p2 = scmp.eq.s32.totalorder %s805_s19, 0 }
   0xf   : > { %s1036_s22 = smov (%p36_p0, %s35_s22), 0  ;;  %s1038_s23 = smov (!%p36_p0, %s38_s23), %s801_s18 }
  0x10   : > { %s43_s25 = ssub.s32 %s797_s17, %s1036_s22  ;;  %p881_p3 = por %p55_p2, %p54_p1 }
  0x11   : > { %p40_p4 = scmp.ge.s32.totalorder %s1038_s23, 2  ;;  %p60_p5 = scmp.ne.s32.totalorder %s781_s13, %s777_s12 }
  0x12   : > { %p61_p6 = scmp.eq.s32.totalorder %s498_s20, 0  ;;  %p114_p7 = scmp.eq.s32.totalorder %s498_s20, 3 }
  0x13   : > { %s1040_s23 = smov (%p40_p4, %s1038_s23), 0  ;;  %p120_p10 = scmp.eq.s32.totalorder %s499_s21, 3 }
  0x14   : > { %1022 = sst [smem:[#allocation14_spill]] %s1040_s23  ;;  %p889_p8 = por %p61_p6, %p60_p5 }
  0x15   : > { %p893_p9 = por %p114_p7, %p54_p1  ;;  %s42_s29 = ssub.s32 %s801_s18, %s1040_s23 }
  0x16   : > { %s44_s30 = sor.u32 %s43_s25, %s42_s29  ;;  %p899_p12 = por %p120_p10, %p60_p5 }
  0x17   : > { %p45_p11 = scmp.eq.s32.totalorder %s44_s30, 0  ;;  %p539_p13 = scmp.lt.s32.totalorder %s805_s19, 4 }
  0x18   : > { %s168_s5 = sand.u32 1, %s785_s14   ;;  %s503_s8 = sshll.u32 %s801_s18, 1 }
  0x19   : > { %s906_s6 = scalar_select %p45_p11, %s785_s14, %s47_s24  }
  0x1a   : > { %s502_s7 = sshll.u32 %s168_s5, 2  ;;  %s176_s9 = sadd.s32 %s797_s17, %s503_s8 }
  0x1b   : > { %s172_s10 = scalar_lea.vmem [#allocation2], %s502_s7  ;;  %s504_s20 = sshll.u32 %s176_s9, 2 }
  0x1c   : > { %s182_s11 = sshll.u32 %s172_s10, 4  ;;  %s178_s29 = scalar_lea.hbm %s1016_s0, %s504_s20  ;;  %s183_s11 = int_to_ptr.vmem [resolvable:$true] %s182_s11 }
  0x1d   : > { %p915_p0 = pnand %p539_p13, %p881_p3  ;;  %s180_s24 = sshll.u32 %s178_s29, 4  ;;  %s181_s24 = int_to_ptr.hbm [resolvable:$true] %s180_s24 }
  0x1e   : > { %p506_p1 = scmp.ge.s32.totalorder %s805_s19, 1  ;;  %s169_s23 = scalar_lea.sflag [#allocation3], %s168_s5 }
  0x1f   : > { %528 = dma.hbm_to_vmem [thread:$0]  (!%p915_p0), %s181_s24, 64, %s183_s11, %s169_s23  }
  0x20   : > { %p206_p2 = scmp.lt.s32.totalorder %s805_s19, 5  ;;  %s197_s10 = scalar_lea.hbm %s1017_s1, %s176_s9 }
  0x21   : > { %s199_s20 = sshll.u32 %s197_s10, 4  ;;  %s192_s26 = scalar_lea.vmem [#allocation5], %s168_s5  ;;  %s200_s20 = int_to_ptr.hbm [resolvable:$true] %s199_s20 }
  0x22   : > { %p207_p4 = pnand %p506_p1, %p206_p2  ;;  %s201_s21 = sshll.u32 %s192_s26, 4  ;;  %s202_s21 = int_to_ptr.vmem [resolvable:$true] %s201_s21 }
  0x23   : > { %s190_s25 = scalar_lea.sflag [#allocation6], %s168_s5  ;;  %s929_s29 = sand.u32 (!%p207_p4), 1, %s781_s13  }
  0x24   : > { %531 = dma.hbm_to_vmem [thread:$0]  (!%p915_p0), %s200_s20, 16, %s202_s21, %s190_s25  }
  0x25   : > { %210 = sbr.rel (%p207_p4) target bundleno = 292 (0x124), region = 28  ;;  %s507_s23 = sshll.u32 (!%p207_p4), %s929_s29, 2 }
  0x26   : > { %s213_s11 = scalar_lea.sflag (!%p207_p4), [#allocation3], %s929_s29  ;;  %s216_s24 = scalar_lea.vmem (!%p207_p4), [#allocation2], %s507_s23 }
  0x2a   : > { %760 = dma.done.wait (%p889_p8), %s213_s11, 64  }
  0x2b   : > { %762 = vsyncadd (%p889_p8), %s213_s11, 4294967232  ;;  %s223_s5 = scalar_lea.sflag [#allocation6], %s929_s29  ;;  %s225_s9 = scalar_lea.vmem [#allocation5], %s929_s29 }
  0x2c   : > { %764 = dma.done.wait (%p889_p8), %s223_s5, 16  }
  0x2d   : > { %766 = vsyncadd (%p889_p8), %s223_s5, 4294967280  ;;  %vm258_vm0 = vcmask 1043456   ;;  %v256_v0 = vld [vmem:[%s216_s24] sm:$0xf]  ;;  %v279_v6 = vlaneseq  ;;  %s508_s27 = sshll.u32 %s789_s15, 7  ;;  %vm303_vm4 = vcmask 1040384  }
  0x2e   : > { %v259_v1 = vsel %vm258_vm0, %v256_v0, -inf  ;;  %v606_v10 = vld [vmem:[%s225_s9] ss:$0 sm:$0xff]  ;;  %v295_v29 = vstv %s508_s27  ;;  %v807_v38 = vmov 0.0   ;;  %s509_s30 = sshll.u32 %s793_s16, 1  ;;  %s249_s26 = scalar_lea.vmem [#allocation7], %s929_s29 }
  0x2f   : > { %v260_v2 = vrot.slane %v259_v1, 4  ;;  %v280_v9 = vshrl.u32 %v279_v6, 7  ;;  %v947_v28 = vand.u32 127, %v279_v6  ;;  %s952_s7 = sadd.s32 %s789_s15, %s509_s30  ;;  %s349_s21 = sshll.u32 %s249_s26, 4  ;;  %s350_s21 = int_to_ptr.vmem [resolvable:$true] %s349_s21 }
  0x30   : > { %s347_s20 = scalar_lea.hbm %s1018_s2, %s952_s7  ;;  %s333_s23 = scalar_lea.sflag [#allocation4], %s929_s29 }
  0x31   : > { %v261_v3 = vmax.f32 %v259_v1, %v260_v2  ;;  %vm282_vm1 = vcmp.eq.s32.totalorder %v280_v9, %v606_v10  ;;  %v296_v33 = vadd.s32 %v295_v29, %v947_v28  ;;  %s351_s25 = sshll.u32 %s347_s20, 4  ;;  %s691_s5 = scalar_lea.hbm %s1018_s2, 4  ;;  %s352_s25 = int_to_ptr.hbm [resolvable:$true] %s351_s25 }
  0x32   : > { %v283_v13 = vsel %vm282_vm1, %v256_v0, 0.0  ;;  %s685_s11 = sshra.s32 %s352_s25, 4  ;;  %s686_s11 = int_to_ptr.hbm [resolvable:$true] %s685_s11 }
  0x33   : > { %v262_v4 = vrot.slane %v261_v3, 2  ;;  %v284_v14 = vsel %vm258_vm0, %v283_v13, 0.0  ;;  %vm297_vm2 = vcmp.lt.s32.totalorder %v296_v33, 256  ;;  %s687_s24 = scalar_lea.hbm %s686_s11, 1  ;;  %p692_p7 = scmp.lt.s32.totalorder %s686_s11, %s1018_s2 }
  0x34   : > { %v285_v17 = vrot.slane %v284_v14, 4  ;;  %p688_p3 = scmp.ne.s32.totalorder %s686_s11, %s687_s24  ;;  %p693_p8 = scmp.lt.s32.totalorder %s691_s5, %s687_s24 }
  0x35   : > { %v263_v5 = vmax.f32 %v261_v3, %v262_v4 }
  0x36   : > { %v286_v20 = vadd.f32 %v285_v17, %v284_v14  ;;  %p689_p5 = pnand %p688_p3, %p893_p9  ;;  %p694_p10 = por %p693_p8, %p692_p7 }
  0x37   : > { %v264_v7 = vrot.slane %v263_v5, 1 }
  0x38   : > { %v287_v23 = vrot.slane %v286_v20, 2  ;;  %p690_p6 = pneg %p689_p5 }
  0x39   : > { %v265_v8 = vmax.f32 %v263_v5, %v264_v7 }
  0x3a   : > { %v288_v26 = vadd.f32 %v287_v23, %v286_v20  ;;  %p695_p11 = pnand %p694_p10, %p690_p6 }
  0x3b   : > { %v266_v11 = vsub.f32 %v256_v0, %v265_v8 }
  0x3c   : > { %v289_v27 = vrot.slane %v288_v26, 1 }
  0x3d   : > { %v267_v12 = vmul.f32 1.442695, %v266_v11 }
  0x3e   : > { %v290_v32 = vadd.f32 %v289_v27, %v288_v26 }
  0x3f   : > { %607 = vpow2.f32 %v267_v12 }
  0x45   : > { %v608_v15 = vpop.eup %607 }
  0x46   : > { %v269_v16 = vsel %vm258_vm0, %v608_v15, 0.0 }
  0x47   : > { %v270_v18 = vrot.slane %v269_v16, 4 }
  0x49   : > { %v271_v19 = vadd.f32 %v270_v18, %v269_v16 }
  0x4b   : > { %v272_v21 = vrot.slane %v271_v19, 2 }
  0x4d   : > { %v273_v22 = vadd.f32 %v272_v21, %v271_v19 }
  0x4f   : > { %v274_v24 = vrot.slane %v273_v22, 1 }
  0x51   : > { %v275_v25 = vadd.f32 %v274_v24, %v273_v22 }
  0x53   : > { %609 = vlog2.f32 %v275_v25 }
  0x59   : > { %v610_v30 = vpop.eup %609 }
  0x5a   : > { %v277_v31 = vmul.f32 0.6931472, %v610_v30 }
  0x5c   : > { %v278_v34 = vadd.f32 %v277_v31, %v265_v8 }
  0x5e   : > { %v291_v35 = vsub.f32 %v278_v34, %v290_v32 }
  0x60   : > { %vm300_vm3 = vcmp.gt.f32.partialorder %v291_v35, 0.7  ;;  %v298_v41 = vsel %vm297_vm2, %v291_v35, -1e+30 }
  0x61   : > { %vm301_vm5 = vmand %vm297_vm2, %vm300_vm3  ;;  %299 = vst [vmem:[%s249_s26] sm:$0x1] %v298_v41 }
  0x62   : > { %v302_v36 = vsel %vm301_vm5, %v291_v35, 0.0  ;;  %v314_v39 = vsel %vm301_vm5, 1.0, %v807_v38 }
  0x63   : > { %v304_v37 = vsel %vm303_vm4, %v302_v36, 0.0  ;;  %v315_v40 = vsel %vm303_vm4, %v314_v39, 0.0 }
  0x64   : > { %305 = vadd.xlane.f32.xlu0 %v304_v37 }
  0x6c   : > { %316 = vadd.xlane.f32.xlu0 %v315_v40 }
  0x6d   : > { %698 = shalt.err (!%p695_p11)
}
  0x6e   : > { %521 = dma.vmem_to_hbm [thread:$0]  (%p893_p9), %s350_s21, 16, %s352_s25, %s333_s23   ;;  %vm326_vm6 = vcmp.eq.s32.totalorder %v947_v28, 1  ;;  %vm325_vm7 = vcmp.eq.s32.totalorder %v947_v28, 0 }
  0x6f   : > { %s362_s10 = scalar_lea.hbm %s1019_s3, %s952_s7  ;;  %s255_s20 = scalar_lea.vmem [#allocation8], %s929_s29 }
  0x70   : > { %s364_s26 = sshll.u32 %s255_s20, 4  ;;  %s366_s25 = sshll.u32 %s362_s10, 4  ;;  %s365_s26 = int_to_ptr.vmem [resolvable:$true] %s364_s26  ;;  %s367_s25 = int_to_ptr.hbm [resolvable:$true] %s366_s25 }
  0x71   : > { %s337_s11 = scalar_lea.sflag [#allocation9], %s929_s29  ;;  %s713_s24 = sshra.s32 %s367_s25, 4  ;;  %s714_s24 = int_to_ptr.hbm [resolvable:$true] %s713_s24 }
  0x72   : > { %s715_s7 = scalar_lea.hbm %s714_s24, 1  ;;  %s719_s5 = scalar_lea.hbm %s1019_s3, 4 }
  0x73   : > { %p716_p13 = scmp.ne.s32.totalorder %s714_s24, %s715_s7  ;;  %p720_p2 = scmp.lt.s32.totalorder %s714_s24, %s1019_s3 }
  0x74   : > { %p721_p4 = scmp.lt.s32.totalorder %s719_s5, %s715_s7 }
  0x75   : > { %p717_p0 = pnand %p716_p13, %p893_p9 }
  0x76   : > { %p722_p3 = por %p721_p4, %p720_p2 }
  0x77   : > { %p718_p1 = pneg %p717_p0 }
  0x79   : > { %p723_p5 = pnand %p722_p3, %p718_p1 }
  0xd7   : > { %v306_v42 = vpop.xlane.xlu0 %305 }
  0xd8   : > { %v307_v43 = vrot.slane %v306_v42, 4 }
  0xda   : > { %v308_v44 = vadd.f32 %v307_v43, %v306_v42 }
  0xdc   : > { %v309_v45 = vrot.slane %v308_v44, 2 }
  0xde   : > { %v310_v46 = vadd.f32 %v309_v45, %v308_v44 }
  0xdf   : > { %v317_v47 = vpop.xlane.xlu0 %316 }
  0xe0   : > { %v318_v48 = vrot.slane %v317_v47, 4  ;;  %v311_v49 = vrot.slane %v310_v46, 1 }
  0xe2   : > { %v319_v50 = vadd.f32 %v318_v48, %v317_v47  ;;  %v312_v51 = vadd.f32 %v311_v49, %v310_v46 }
  0xe4   : > { %v320_v52 = vrot.slane %v319_v50, 2  ;;  %513 = vpush %v312_v51 }
  0xe6   : > { %v321_v53 = vadd.f32 %v320_v52, %v319_v50 }
  0xe8   : > { %v322_v54 = vrot.slane %v321_v53, 1 }
  0xea   : > { %v323_v55 = vadd.f32 %v322_v54, %v321_v53 }
  0xec   : > { %515 = vpush %v323_v55 }
 0x115   : > { %s514_s21 = spop %513 }
 0x116   : > { %v329_v57 = vstv %s514_s21 }
 0x11d   : > { %s516_s23 = spop %515 }
 0x11e   : > { %v327_v56 = vstv %s516_s23 }
 0x11f   : > { %v328_v58 = vsel %vm326_vm6, %v327_v56, 0.0 }
 0x120   : > { %v330_v59 = vsel %vm325_vm7, %v329_v57, %v328_v58 }
 0x121   : > { %331 = vst [vmem:[%s255_s20] sm:$0x1] %v330_v59 }
 0x122   : > { %726 = shalt.err (!%p723_p5)
}
 0x123   : > { %522 = dma.vmem_to_hbm [thread:$0]  (%p893_p9), %s365_s26, 16, %s367_s25, %s337_s11  }
 0x124 PF: > { %p540_p6 = scmp.ge.s32.totalorder %s805_s19, 2  ;;  %s378_s29 = sand.u32 1, %s777_s12  }
 0x125   : > { %s379_s30 = scalar_lea.sflag [#allocation4], %s378_s29 }
 0x126   : > { %p533_p7 = pnand %p540_p6, %p899_p12 }
 0x128   : > { %p534_p8 = pneg %p533_p7 }
 0x12a   : > { %768 = dma.done.wait (%p534_p8), %s379_s30, 16  }
 0x12b   : > { %770 = vsyncadd (%p534_p8), %s379_s30, 4294967280  ;;  %s388_s8 = scalar_lea.sflag [#allocation9], %s378_s29 }
 0x12c   : > { %772 = dma.done.wait (%p534_p8), %s388_s8, 16  }
 0x12d   : > { %774 = vsyncadd (%p534_p8), %s388_s8, 4294967280  ;;  %s26_s19 = sadd.s32 1, %s805_s19   ;;  %s1027_s28 = sld [smem:[#allocation14_spill]] }
 0x12e   : > { %p23_p10 = scmp.ge.s32.totalorder %s26_s19, 6   ;;  %s1028_s12 = smov %s781_s13 }
 0x12f   : > { %s1029_s13 = smov %s785_s14  ;;  %s1030_s14 = smov %s906_s6 }
 0x130   : > { %s1031_s15 = smov %s797_s17  ;;  %s1032_s16 = smov %s801_s18 }
 0x131   : > { %s1033_s17 = smov %s1036_s22  ;;  %25 = sbr.rel (!%p23_p10) target bundleno = 11 (0xb), region = 103 }
 0x133   : > { %s1034_s18 = smov %s1027_s28 }
 0x136   :  { %393 = vsyncpa [#allocation3], 1 }
 0x137   :  { %395 = vsyncpa [#allocation3 + $0x1], 1 }
 0x138   :  { %396 = vsyncpa [#allocation6], 1 }
 0x139   :  { %398 = vsyncpa [#allocation6 + $0x1], 1 }
 0x13a   :  { %399 = vsyncpa [#allocation4], 1 }
 0x13b   :  { %401 = vsyncpa [#allocation4 + $0x1], 1 }
 0x13c   :  { %402 = vsyncpa [#allocation9], 1 }
 0x13d   :  { %404 = vsyncpa [#allocation9 + $0x1], 1 }

</bundles_post_ra>
